<compile_context>
chip_gen: v7x
topology: tpu7x:2x2x1
jax: 0.10.0
libtpu: 0.0.40
codegen_flags: <defaults>
</compile_context>

<pallas_src>
import functools

import jax
import jax.numpy as jnp
from jax.experimental import pallas as pl
from jax.experimental.pallas import tpu as pltpu


# ----------------------------------------------------------------------------- specs

def _inv(shape):
    """Block-invariant spec: full-array block, same block for every grid step."""
    nd = len(shape)
    return pl.BlockSpec(tuple(shape), lambda i: (0,) * nd)


# ----------------------------------------------------------------------------- kernels

def encoder_kernel(x_ref, w1_ref, b1_ref, w2_ref, b2_ref, feat_ref, logit_ref):
    """Query-only encoder (cls_only path): feats = x@W1+b1 ; logits = feats@W2+b2."""
    bf16, f32 = jnp.bfloat16, jnp.float32
    feats = jnp.dot(x_ref[...].astype(bf16), w1_ref[...].astype(bf16),
                    preferred_element_type=f32) + b1_ref[...]
    feat_ref[...] = feats
    logit_ref[...] = jnp.dot(feats.astype(bf16), w2_ref[...].astype(bf16),
                             preferred_element_type=f32) + b2_ref[...]


def encoder_ema_kernel(xq_ref, xk_ref,
                       w1q_ref, b1q_ref, w2q_ref, b2q_ref,
                       w1k_ref, b1k_ref, w2k_ref, b2k_ref,
                       featsq_ref, logitsq_ref, q_ref, k_ref,
                       w1kn_ref, b1kn_ref, w2kn_ref, b2kn_ref,
                       accq_ref, acck_ref,
                       *, m):
    """Query encoder + streamed EMA update of the key encoder + key encoder + normalize.

    Grid axis = row-blocks of F_in.  Each step: EMA-update one (TF, D) block of the
    first-layer weights in place and accumulate the partial first-layer matmuls for
    query and key features; the last step finishes biases, the classifier head, the
    small second-layer EMA and L2 normalization.
    """
    bf16, f32 = jnp.bfloat16, jnp.float32
    r = pl.program_id(0)

    @pl.when(r == 0)
    def _():
        accq_ref[...] = jnp.zeros_like(accq_ref)
        acck_ref[...] = jnp.zeros_like(acck_ref)

    # ---- streamed EMA of this (TF, D) block of the first-layer weights (in place) ----
    w1q_blk = w1q_ref[...]
    w1k_new = w1k_ref[...] * m + w1q_blk * (1.0 - m)
    w1kn_ref[...] = w1k_new

    # ---- partial first-layer matmuls (bf16 MXU operands, f32 accumulation) ----
    accq_ref[...] += jnp.dot(xq_ref[...].astype(bf16), w1q_blk.astype(bf16),
                             preferred_element_type=f32)
    acck_ref[...] += jnp.dot(xk_ref[...].astype(bf16), w1k_new.astype(bf16),
                             preferred_element_type=f32)

    @pl.when(r == pl.num_programs(0) - 1)
    def _():
        b1q = b1q_ref[...]
        w2q = w2q_ref[...]
        b2q = b2q_ref[...]

        # EMA of the small remaining key params (f32, VPU), written in place.
        b1k_new = b1k_ref[...] * m + b1q * (1.0 - m)
        w2k_new = w2k_ref[...] * m + w2q * (1.0 - m)
        b2k_new = b2k_ref[...] * m + b2q * (1.0 - m)
        b1kn_ref[...] = b1k_new
        w2kn_ref[...] = w2k_new
        b2kn_ref[...] = b2k_new

        feats_q = accq_ref[...] + b1q
        feats_k = acck_ref[...] + b1k_new

        featsq_ref[...] = feats_q
        logitsq_ref[...] = jnp.dot(feats_q.astype(bf16), w2q.astype(bf16),
                                   preferred_element_type=f32) + b2q

        # F.normalize(dim=1) via rsqrt; clamp ||x||^2 at eps^2 = (1e-12)^2.
        eps2 = 1e-24
        q = feats_q * jax.lax.rsqrt(
            jnp.maximum(jnp.sum(feats_q * feats_q, axis=1, keepdims=True), eps2))
        k = feats_k * jax.lax.rsqrt(
            jnp.maximum(jnp.sum(feats_k * feats_k, axis=1, keepdims=True), eps2))
        q_ref[...] = q
        k_ref[...] = k


def instance_logits_kernel(q_ref, k_ref, mem_ref, ins_ref, *, inv_t):
    """One (B, TN) lane-dense tile of the instance-logit slab.

    The bank is stored bf16, pre-padded with column 0 zero, so the matmul already
    lands l_neg in columns 1..K of the slab; l_pos is merged into column 0 on tile 0
    only (pl.when), other tiles store the dot result directly.
    """
    bf16, f32 = jnp.bfloat16, jnp.float32
    j = pl.program_id(0)
    q = q_ref[...]
    tile = jnp.dot(q.astype(bf16), mem_ref[...],
                   preferred_element_type=f32) * inv_t            # (B, TN)

    @pl.when(j == 0)
    def _():
        l_pos = jnp.sum(q * k_ref[...], axis=1, keepdims=True) * inv_t   # (B, 1), f32
        col = jax.lax.broadcasted_iota(jnp.int32, tile.shape, 1)
        ins_ref[...] = jnp.where(col == 0, l_pos, tile)

    @pl.when(j != 0)
    def _():
        ins_ref[...] = tile


# ----------------------------------------------------------------------------- wrappers

def encoder_forward(x, w1, b1, w2, b2):
    B = x.shape[0]
    F_in, D = w1.shape
    Cp = w2.shape[1]
    cost = pl.CostEstimate(
        flops=2 * B * (F_in * D + D * Cp),
        transcendentals=0,
        bytes_accessed=4 * (x.size + w1.size + b1.size + w2.size + b2.size
                            + B * D + B * Cp))
    return pl.pallas_call(
        encoder_kernel,
        grid=(1,),
        in_specs=[_inv(a.shape) for a in (x, w1, b1, w2, b2)],
        out_specs=[_inv((B, D)), _inv((B, Cp))],
        out_shape=(jax.ShapeDtypeStruct((B, D), jnp.float32),
                   jax.ShapeDtypeStruct((B, Cp), jnp.float32)),
        compiler_params=pltpu.CompilerParams(dimension_semantics=("arbitrary",)),
        cost_estimate=cost,
    )(x, w1, b1, w2, b2)


def encoder_ema_forward(xq, xk, params_q, params_k, *, m, tile_f=256):
    """Fused query encoder + streamed EMA + key encoder + L2 normalize."""
    B, F_in = xq.shape
    w1q, b1q, w2q, b2q = params_q
    w1k, b1k, w2k, b2k = params_k
    D = w1q.shape[1]
    Cp = w2q.shape[1]
    if F_in % tile_f != 0:
        tile_f = F_in                       # fall back to a single row-block
    n_steps = F_in // tile_f

    in_specs = [
        pl.BlockSpec((B, tile_f), lambda r: (0, r)),    # xq row-block
        pl.BlockSpec((B, tile_f), lambda r: (0, r)),    # xk row-block
        pl.BlockSpec((tile_f, D), lambda r: (r, 0)),    # w1q row-block
        _inv(b1q.shape),
        _inv(w2q.shape),
        _inv(b2q.shape),
        pl.BlockSpec((tile_f, D), lambda r: (r, 0)),    # w1k row-block (aliased)
        _inv(b1k.shape),
        _inv(w2k.shape),
        _inv(b2k.shape),
    ]
    out_shape = (
        jax.ShapeDtypeStruct((B, D), jnp.float32),      # feats_q (pre-normalization)
        jax.ShapeDtypeStruct((B, Cp), jnp.float32),     # logits_q (padded classes)
        jax.ShapeDtypeStruct((B, D), jnp.float32),      # q (normalized)
        jax.ShapeDtypeStruct((B, D), jnp.float32),      # k (normalized)
        jax.ShapeDtypeStruct(w1k.shape, w1k.dtype),     # updated key params
        jax.ShapeDtypeStruct(b1k.shape, b1k.dtype),
        jax.ShapeDtypeStruct(w2k.shape, w2k.dtype),
        jax.ShapeDtypeStruct(b2k.shape, b2k.dtype),
    )
    out_specs = [
        _inv((B, D)), _inv((B, Cp)), _inv((B, D)), _inv((B, D)),
        # identical block_shape + index_map as the aliased w1k input -> in-place safe
        pl.BlockSpec((tile_f, D), lambda r: (r, 0)),
        _inv(b1k.shape), _inv(w2k.shape), _inv(b2k.shape),
    ]
    cost = pl.CostEstimate(
        flops=2 * B * (2 * F_in * D + D * Cp)
              + 4 * (F_in * D + D + D * Cp + Cp),       # EMA elementwise
        transcendentals=2 * B,                          # rsqrt per row (q and k)
        bytes_accessed=4 * (xq.size + xk.size
                            + (w1q.size + b1q.size + w2q.size + b2q.size)
                            + 2 * (w1k.size + b1k.size + w2k.size + b2k.size)
                            + 4 * B * D + B * Cp))

    return pl.pallas_call(
        functools.partial(encoder_ema_kernel, m=m),
        grid=(n_steps,),
        in_specs=in_specs,
        out_specs=out_specs,
        out_shape=out_shape,
        scratch_shapes=[pltpu.VMEM((B, D), jnp.float32),    # feats_q accumulator
                        pltpu.VMEM((B, D), jnp.float32)],   # feats_k accumulator
        # key-encoder params updated in place: inputs 6..9 alias outputs 4..7
        input_output_aliases={6: 4, 7: 5, 8: 6, 9: 7},
        compiler_params=pltpu.CompilerParams(dimension_semantics=("arbitrary",)),
        cost_estimate=cost,
    )(xq, xk, w1q, b1q, w2q, b2q, w1k, b1k, w2k, b2k)


def instance_logits(q, k, mem_padded_bf16, *, t_moco, tile_n=None):
    """Lane-dense (B, LPAD) instance-logit slab, bank streamed over a parallel grid."""
    B, D = q.shape
    LPAD = mem_padded_bf16.shape[1]
    if tile_n is None:
        tile_n = next(t for t in (1024, 512, 256, 128) if LPAD % t == 0)
    cost = pl.CostEstimate(
        flops=2 * B * D * LPAD,
        transcendentals=0,
        bytes_accessed=4 * (q.size + k.size + B * LPAD) + 2 * mem_padded_bf16.size)
    return pl.pallas_call(
        functools.partial(instance_logits_kernel, inv_t=1.0 / t_moco),
        grid=(LPAD // tile_n,),
        in_specs=[_inv((B, D)),                              # q (block-invariant)
                  _inv((B, D)),                              # k (block-invariant)
                  pl.BlockSpec((D, tile_n), lambda j: (0, j))],  # bank tile (bf16)
        out_specs=pl.BlockSpec((B, tile_n), lambda j: (0, j)),
        out_shape=jax.ShapeDtypeStruct((B, LPAD), jnp.float32),
        compiler_params=pltpu.CompilerParams(dimension_semantics=("parallel",)),
        cost_estimate=cost,
    )(q, k, mem_padded_bf16)


def pad_memory_bank(mem_feat):
    """Store the (D, K) memory bank lane-dense and bf16 as (D, round_up(1+K, 128)):
    column 0 reserved for l_pos, columns 1..K hold the bank, rest zero.  Done once at
    init time (the module normalizes the bank in __init__ anyway)."""
    D, K = mem_feat.shape
    lpad = pl.cdiv(1 + K, 128) * 128
    bank = jnp.zeros((D, lpad), jnp.float32).at[:, 1:1 + K].set(mem_feat)
    return bank.astype(jnp.bfloat16)


def adamoco_forward(params_q, params_k, mem_feat_padded, K, im_q, im_k=None,
                    m=0.999, t_moco=0.07, cls_only=False, num_classes=None):
    """Mirrors AdaMoCo.forward.

    Returns:
      cls_only:  (feats_q, logits_q)
      otherwise: (feats_q, logits_q, logits_ins, k, updated_params_k)
    """
    B = im_q.shape[0]
    xq = im_q.reshape(B, -1)   # NCHW flatten (row-major), matches torch .view(B, -1)

    if cls_only:
        feats_q, logits_q = encoder_forward(xq, *params_q)
        if num_classes is not None:
            logits_q = logits_q[:, :num_classes]
        return feats_q, logits_q

    xk = im_k.reshape(B, -1)
    (feats_q, logits_q, q, k_out,
     w1k, b1k, w2k, b2k) = encoder_ema_forward(xq, xk, params_q, params_k, m=m)
    ins_slab = instance_logits(q, k_out, mem_feat_padded, t_moco=t_moco)
    logits_ins = ins_slab[:, :1 + K]          # [l_pos | l_neg], already /T
    if num_classes is not None:
        logits_q = logits_q[:, :num_classes]
    return feats_q, logits_q, logits_ins, k_out, (w1k, b1k, w2k, b2k)


# ----------------------------------------------------------------------------- main

if __name__ == "__main__":
    # small, TPU-friendly shapes (B=16 fills a bf16 (16,128) sublane tile)
    B, C_in, H, W = 16, 3, 16, 16
    F_in = C_in * H * W            # 768
    D = 128                        # feature dim (src_model.output_dim)
    C_cls = 16                     # num_classes
    C_pad = 128                    # classifier head stored lane-dense
    K = 256                        # memory bank size
    M_MOM = 0.999
    T_MOCO = 0.07

    key = jax.random.PRNGKey(0)
    keys = jax.random.split(key, 10)

    # deterministic synthetic encoder params (query / source model); head padded to 128
    w1_q = jax.random.normal(keys[0], (F_in, D), jnp.float32) * 0.05
    b1_q = jax.random.normal(keys[1], (1, D), jnp.float32) * 0.01
    w2_q = jnp.zeros((D, C_pad), jnp.float32).at[:, :C_cls].set(
        jax.random.normal(keys[2], (D, C_cls), jnp.float32) * 0.05)
    b2_q = jnp.zeros((1, C_pad), jnp.float32).at[:, :C_cls].set(
        jax.random.normal(keys[3], (1, C_cls), jnp.float32) * 0.01)
    params_q = (w1_q, b1_q, w2_q, b2_q)

    # momentum (key) encoder params (independently perturbed copies)
    pk_keys = jax.random.split(keys[4], 4)
    params_k = tuple(p + 0.01 * jax.random.normal(kk, p.shape, jnp.float32)
                     for p, kk in zip(params_q, pk_keys))
    # keep the padded classifier columns exactly zero in the key encoder too
    params_k = (params_k[0], params_k[1],
                params_k[2].at[:, C_cls:].set(0.0),
                params_k[3].at[:, C_cls:].set(0.0))

    # memory bank: randn(D, K), L2-normalized along dim 0 (per-column), as in __init__;
    # stored pre-padded, lane-dense and bf16 for the streamed l_neg matmul.
    mem_feat = jax.random.normal(keys[5], (D, K), jnp.float32)
    mem_feat = mem_feat / jnp.maximum(
        jnp.sqrt(jnp.sum(mem_feat * mem_feat, axis=0, keepdims=True)), 1e-12)
    mem_feat_padded = pad_memory_bank(mem_feat)

    # input images (NCHW)
    im_q = jax.random.normal(keys[6], (B, C_in, H, W), jnp.float32)
    im_k = jax.random.normal(keys[7], (B, C_in, H, W), jnp.float32)

    # cls_only path
    feats_cls, logits_cls = adamoco_forward(
        params_q, params_k, mem_feat_padded, K, im_q,
        m=M_MOM, t_moco=T_MOCO, cls_only=True, num_classes=C_cls)

    # full MoCo forward (fused encoders/EMA kernel + streamed instance-logit kernel)
    feats_q, logits_q, logits_ins, k_out, params_k_new = adamoco_forward(
        params_q, params_k, mem_feat_padded, K, im_q, im_k,
        m=M_MOM, t_moco=T_MOCO, num_classes=C_cls)

    jax.block_until_ready((feats_cls, logits_cls, feats_q, logits_q,
                           logits_ins, k_out, params_k_new))

    assert feats_cls.shape == (B, D)
    assert logits_cls.shape == (B, C_cls)
    assert feats_q.shape == (B, D)
    assert logits_q.shape == (B, C_cls)
    assert logits_ins.shape == (B, 1 + K)
    assert k_out.shape == (B, D)
    assert all(pn.shape == pk.shape for pn, pk in zip(params_k_new, params_k))
    assert bool(jnp.all(jnp.isfinite(logits_ins)))
    assert bool(jnp.all(jnp.isfinite(k_out)))

    print("KERNEL_OK")
</pallas_src>

<mosaic_0001>
module attributes {stable_mosaic.version = 11 : i64} {
  func.func @encoder_kernel(%arg0: i32, %arg1: memref<16x768xf32, #tpu.memory_space<vmem>>, %arg2: memref<768x128xf32, #tpu.memory_space<vmem>>, %arg3: memref<1x128xf32, #tpu.memory_space<vmem>>, %arg4: memref<128x128xf32, #tpu.memory_space<vmem>>, %arg5: memref<1x128xf32, #tpu.memory_space<vmem>>, %arg6: memref<16x128xf32, #tpu.memory_space<vmem>>, %arg7: memref<16x128xf32, #tpu.memory_space<vmem>>) attributes {dimension_semantics = [#tpu.dimension_semantics<arbitrary>], iteration_bounds = array<i64: 1>, scalar_prefetch = 0 : i64, scratch_operands = 0 : i64, tpu.core_type = #tpu.core_type<tc>, window_params = [{pipeline_mode = #tpu.pipeline_mode<synchronous>, transform_indices = @transform_0, window_bounds = array<i64: 16, 768>}, {pipeline_mode = #tpu.pipeline_mode<synchronous>, transform_indices = @transform_1, window_bounds = array<i64: 768, 128>}, {pipeline_mode = #tpu.pipeline_mode<synchronous>, transform_indices = @transform_2, window_bounds = array<i64: 1, 128>}, {pipeline_mode = #tpu.pipeline_mode<synchronous>, transform_indices = @transform_3, window_bounds = array<i64: 128, 128>}, {pipeline_mode = #tpu.pipeline_mode<synchronous>, transform_indices = @transform_4, window_bounds = array<i64: 1, 128>}, {pipeline_mode = #tpu.pipeline_mode<synchronous>, transform_indices = @transform_5, window_bounds = array<i64: 16, 128>}, {pipeline_mode = #tpu.pipeline_mode<synchronous>, transform_indices = @transform_6, window_bounds = array<i64: 16, 128>}]} {
    %c0 = arith.constant 0 : index
    %c0_0 = arith.constant 0 : index
    %0 = vector.load %arg1[%c0, %c0_0] : memref<16x768xf32, #tpu.memory_space<vmem>>, vector<16x768xf32>
    %1 = arith.truncf %0 : vector<16x768xf32> to vector<16x768xbf16>
    %c0_1 = arith.constant 0 : index
    %c0_2 = arith.constant 0 : index
    %2 = vector.load %arg2[%c0_1, %c0_2] : memref<768x128xf32, #tpu.memory_space<vmem>>, vector<768x128xf32>
    %3 = arith.truncf %2 : vector<768x128xf32> to vector<768x128xbf16>
    %cst = arith.constant dense<0.000000e+00> : vector<16x128xf32>
    %4 = tpu.matmul %1, %3, %cst {dimension_numbers = #tpu.dot_dimension_numbers<[1], [0], [0], [1], [0, 0, 1, 1], [], []>} : vector<16x768xbf16>, vector<768x128xbf16>, vector<16x128xf32> -> vector<16x128xf32>
    %c0_3 = arith.constant 0 : index
    %c0_4 = arith.constant 0 : index
    %5 = vector.load %arg3[%c0_3, %c0_4] : memref<1x128xf32, #tpu.memory_space<vmem>>, vector<1x128xf32>
    %6 = vector.broadcast %5 : vector<1x128xf32> to vector<16x128xf32>
    %7 = arith.addf %4, %6 : vector<16x128xf32>
    %c0_5 = arith.constant 0 : index
    %c0_6 = arith.constant 0 : index
    %8 = vector.load %arg6[%c0_5, %c0_6] : memref<16x128xf32, #tpu.memory_space<vmem>>, vector<16x128xf32>
    tpu.vector_store %arg6[%c0_5, %c0_6], %7 {strides = array<i32>} : memref<16x128xf32, #tpu.memory_space<vmem>>, vector<16x128xf32>,
    %9 = arith.truncf %7 : vector<16x128xf32> to vector<16x128xbf16>
    %c0_7 = arith.constant 0 : index
    %c0_8 = arith.constant 0 : index
    %10 = vector.load %arg4[%c0_7, %c0_8] : memref<128x128xf32, #tpu.memory_space<vmem>>, vector<128x128xf32>
    %11 = arith.truncf %10 : vector<128x128xf32> to vector<128x128xbf16>
    %cst_9 = arith.constant dense<0.000000e+00> : vector<16x128xf32>
    %12 = tpu.matmul %9, %11, %cst_9 {dimension_numbers = #tpu.dot_dimension_numbers<[1], [0], [0], [1], [0, 0, 1, 1], [], []>} : vector<16x128xbf16>, vector<128x128xbf16>, vector<16x128xf32> -> vector<16x128xf32>
    %c0_10 = arith.constant 0 : index
    %c0_11 = arith.constant 0 : index
    %13 = vector.load %arg5[%c0_10, %c0_11] : memref<1x128xf32, #tpu.memory_space<vmem>>, vector<1x128xf32>
    %14 = vector.broadcast %13 : vector<1x128xf32> to vector<16x128xf32>
    %15 = arith.addf %12, %14 : vector<16x128xf32>
    %c0_12 = arith.constant 0 : index
    %c0_13 = arith.constant 0 : index
    %16 = vector.load %arg7[%c0_12, %c0_13] : memref<16x128xf32, #tpu.memory_space<vmem>>, vector<16x128xf32>
    tpu.vector_store %arg7[%c0_12, %c0_13], %15 {strides = array<i32>} : memref<16x128xf32, #tpu.memory_space<vmem>>, vector<16x128xf32>,
    return
  }
  func.func @transform_0(%arg0: i32) -> (i32, i32) {
    %c0_i32 = arith.constant 0 : i32
    %c0_i32_0 = arith.constant 0 : i32
    %c0_i32_1 = arith.constant 0 : i32
    return %c0_i32, %c0_i32_0 : i32, i32
  }
  func.func @transform_1(%arg0: i32) -> (i32, i32) {
    %c0_i32 = arith.constant 0 : i32
    %c0_i32_0 = arith.constant 0 : i32
    %c0_i32_1 = arith.constant 0 : i32
    return %c0_i32, %c0_i32_0 : i32, i32
  }
  func.func @transform_2(%arg0: i32) -> (i32, i32) {
    %c0_i32 = arith.constant 0 : i32
    %c0_i32_0 = arith.constant 0 : i32
    %c0_i32_1 = arith.constant 0 : i32
    return %c0_i32, %c0_i32_0 : i32, i32
  }
  func.func @transform_3(%arg0: i32) -> (i32, i32) {
    %c0_i32 = arith.constant 0 : i32
    %c0_i32_0 = arith.constant 0 : i32
    %c0_i32_1 = arith.constant 0 : i32
    return %c0_i32, %c0_i32_0 : i32, i32
  }
  func.func @transform_4(%arg0: i32) -> (i32, i32) {
    %c0_i32 = arith.constant 0 : i32
    %c0_i32_0 = arith.constant 0 : i32
    %c0_i32_1 = arith.constant 0 : i32
    return %c0_i32, %c0_i32_0 : i32, i32
  }
  func.func @transform_5(%arg0: i32) -> (i32, i32) {
    %c0_i32 = arith.constant 0 : i32
    %c0_i32_0 = arith.constant 0 : i32
    %c0_i32_1 = arith.constant 0 : i32
    return %c0_i32, %c0_i32_0 : i32, i32
  }
  func.func @transform_6(%arg0: i32) -> (i32, i32) {
    %c0_i32 = arith.constant 0 : i32
    %c0_i32_0 = arith.constant 0 : i32
    %c0_i32_1 = arith.constant 0 : i32
    return %c0_i32, %c0_i32_0 : i32, i32
  }
}

</mosaic_0001>

<bundles_post_ra>
// kernel: tpu_custom_call.1
= control target key start
LH: loop header
LB: loop body
LE: loop exit
PB: predicated region body
PF: predicated region fallthrough
CT: control target
= control target key end

     0   :  { %12 = vsyncpa [#allocation3], 0  ;;  %s819_s0 = inlined_call_operand.hbm [shape: f32[16,768], index: 0, kind: input, shape index: {}]   ;;  %s820_s1 = inlined_call_operand.hbm [shape: f32[768,128], index: 1, kind: input, shape index: {}]   ;;  %s821_s2 = inlined_call_operand.vmem [shape: f32[1,128], index: 2, kind: input, shape index: {}]   ;;  %s822_s3 = inlined_call_operand.hbm [shape: f32[128,128], index: 3, kind: input, shape index: {}]   ;;  %s823_s4 = inlined_call_operand.vmem [shape: f32[1,128], index: 4, kind: input, shape index: {}]   ;;  %s824_s5 = inlined_call_operand.hbm [shape: f32[16,128], index: 5, kind: output, shape index: {0}]   ;;  %s825_s6 = inlined_call_operand.hbm [shape: f32[16,128], index: 6, kind: output, shape index: {1}]  }
   0x1   :  { %13 = vsyncpa [#allocation6], 0 }
   0x2   :  { %14 = vsyncpa [#allocation4], 0 }
   0x3   :  { %15 = vsyncpa [#allocation10], 0  ;;  %s695_s21 = smov [#allocation5]   ;;  %s577_s25 = scalar_lea.hbm %s820_s1, 12288 }
   0x4   :  { %s33_s22 = sshll.u32 %s695_s21, 4  ;;  %p578_p0 = scmp.ne.s32.totalorder %s820_s1, %s577_s25  ;;  %s34_s22 = int_to_ptr.vmem [resolvable:$true] %s33_s22 }
   0x5   :  { %p581_p1 = scmp.lt.u32.totalorder %s577_s25, %s820_s1 }
   0x7   :  { %p583_p2 = pnand %p581_p1, %p578_p0 }
   0x9   :  { %586 = shalt.err (!%p583_p2)
}
   0xa   :  { %s587_s30 = scalar_lea.vmem %s34_s22, 12288  ;;  %p592_p4 = scmp.lt.s32.totalorder %s34_s22, %s34_s22 }
   0xb   :  { %p588_p3 = scmp.ne.s32.totalorder %s34_s22, %s587_s30  ;;  %p593_p5 = scmp.lt.s32.totalorder %s587_s30, %s587_s30 }
   0xd   :  { %p594_p6 = por %p593_p5, %p592_p4 }
   0xf   :  { %p595_p7 = pnand %p594_p6, %p588_p3 }
  0x11   :  { %598 = shalt.err (!%p595_p7)
}
  0x12   :  { %s696_s7 = smov 128   ;;  %s697_s8 = smov 8  }
  0x13   :  { %39 = dma.hbm_to_vmem [thread:$0]  %s820_s1, 12288, %s34_s22, [#allocation6], %s696_s7, %s696_s7, %s697_s8  }
  0x14   :  { %s698_s11 = smov [#allocation2]   ;;  %s599_s15 = scalar_lea.hbm %s819_s0, 1536 }
  0x15   :  { %s21_s12 = sshll.u32 %s698_s11, 4  ;;  %p600_p8 = scmp.ne.s32.totalorder %s819_s0, %s599_s15  ;;  %s22_s12 = int_to_ptr.vmem [resolvable:$true] %s21_s12 }
  0x16   :  { %p603_p9 = scmp.lt.u32.totalorder %s599_s15, %s819_s0 }
  0x18   :  { %p605_p10 = pnand %p603_p9, %p600_p8 }
  0x1a   :  { %608 = shalt.err (!%p605_p10)
}
  0x1b   :  { %s609_s20 = scalar_lea.vmem %s22_s12, 1536  ;;  %p614_p12 = scmp.lt.s32.totalorder %s22_s12, %s22_s12 }
  0x1c   :  { %p610_p11 = scmp.ne.s32.totalorder %s22_s12, %s609_s20  ;;  %p615_p13 = scmp.lt.s32.totalorder %s609_s20, %s609_s20 }
  0x1e   :  { %p616_p0 = por %p615_p13, %p614_p12 }
  0x20   :  { %p617_p1 = pnand %p616_p0, %p610_p11 }
  0x22   :  { %620 = shalt.err (!%p617_p1)
}
  0x23   :  { %s699_s1 = smov 768   ;;  %s700_s21 = smov 48  }
  0x24   :  { %27 = dma.hbm_to_vmem [thread:$0]  %s819_s0, 1536, %s22_s12, [#allocation3], %s699_s1, %s699_s1, %s700_s21  }
  0x25   :  { %s701_s24 = smov [#allocation7]   ;;  %s621_s28 = scalar_lea.hbm %s822_s3, 2048 }
  0x26   :  { %s47_s25 = sshll.u32 %s701_s24, 4  ;;  %p622_p2 = scmp.ne.s32.totalorder %s822_s3, %s621_s28  ;;  %s48_s25 = int_to_ptr.vmem [resolvable:$true] %s47_s25 }
  0x27   :  { %p625_p3 = scmp.lt.u32.totalorder %s621_s28, %s822_s3 }
  0x29   :  { %p627_p4 = pnand %p625_p3, %p622_p2 }
  0x2b   :  { %630 = shalt.err (!%p627_p4)
}
  0x2c   :  { %s631_s11 = scalar_lea.vmem %s48_s25, 2048  ;;  %p636_p6 = scmp.lt.s32.totalorder %s48_s25, %s48_s25 }
  0x2d   :  { %p632_p5 = scmp.ne.s32.totalorder %s48_s25, %s631_s11  ;;  %p637_p7 = scmp.lt.s32.totalorder %s631_s11, %s631_s11 }
  0x2f   :  { %p638_p8 = por %p637_p7, %p636_p6 }
  0x31   :  { %p639_p9 = pnand %p638_p8, %p632_p5 }
  0x33   :  { %642 = shalt.err (!%p639_p9)
}
  0x34   :  { %53 = dma.hbm_to_vmem [thread:$0]  %s822_s3, 2048, %s48_s25, [#allocation6], %s696_s7, %s696_s7, %s697_s8  }
  0x35   :  { %687 = dma.done.wait [#allocation3], 1536  }
  0x36   :  { %688 = vsyncadd [#allocation3], 4294965760 }
  0x37   :  { %689 = dma.done.wait [#allocation6], 14336  }
  0x38   :  { %690 = vsyncadd [#allocation6], 4294952960  ;;  %v100_v0 = vld [vmem:[#allocation5 + $0x80] sm:$0xff]  ;;  %v101_v1 = vld [vmem:[#allocation5 + $0x88] sm:$0xff]  ;;  %vm703_vm0 = vmmov 0  }
  0x39   :  { %v84_v2 = vld [vmem:[#allocation5] sm:$0xff]  ;;  %v188_v3 = vpack.c.bf16 %v101_v1, %v100_v0  ;;  %v85_v4 = vld [vmem:[#allocation5 + $0x8] sm:$0xff]  ;;  %v102_v11 = vld [vmem:[#allocation5 + $0x90] sm:$0xff] }
  0x3a   :  { %v132_v5 = vld [vmem:[#allocation5 + $0x180] sm:$0xff]  ;;  %v133_v6 = vld [vmem:[#allocation5 + $0x188] sm:$0xff]  ;;  %v180_v7 = vpack.c.bf16 %v85_v4, %v84_v2  ;;  %v103_v13 = vld [vmem:[#allocation5 + $0x98] sm:$0xff] }
  0x3b   :  { %v204_v8 = vpack.c.bf16 %v133_v6, %v132_v5  ;;  %v116_v9 = vld [vmem:[#allocation5 + $0x100] sm:$0xff]  ;;  %v117_v10 = vld [vmem:[#allocation5 + $0x108] sm:$0xff]  ;;  %471 = vmatprep.subr.bf16.mxu0 %v188_v3  ;;  %v86_v14 = vld [vmem:[#allocation5 + $0x10] sm:$0xff]  ;;  %v189_v16 = vpack.c.bf16 %v103_v13, %v102_v11 }
  0x3c   :  { %v196_v12 = vpack.c.bf16 %v117_v10, %v116_v9  ;;  %v87_v15 = vld [vmem:[#allocation5 + $0x18] sm:$0xff]  ;;  %472 = vmatpush3.bf16.msra.mxu0 %v180_v7  ;;  %v134_v18 = vld [vmem:[#allocation5 + $0x190] sm:$0xff]  ;;  %v104_v23 = vld [vmem:[#allocation5 + $0xa0] sm:$0xff] }
  0x3d   :  { %493 = vmatprep.subr.bf16.mxu1 %v204_v8  ;;  %v181_v17 = vpack.c.bf16 %v87_v15, %v86_v14  ;;  %v135_v19 = vld [vmem:[#allocation5 + $0x198] sm:$0xff]  ;;  %v118_v20 = vld [vmem:[#allocation5 + $0x110] sm:$0xff]  ;;  %v105_v24 = vld [vmem:[#allocation5 + $0xa8] sm:$0xff]  ;;  %473 = vmatprep.subr.bf16.mxu0 %v189_v16 }
  0x3e   :  { %494 = vmatpush3.bf16.msra.mxu1 %v196_v12  ;;  %v205_v21 = vpack.c.bf16 %v135_v19, %v134_v18  ;;  %v119_v22 = vld [vmem:[#allocation5 + $0x118] sm:$0xff]  ;;  %v190_v26 = vpack.c.bf16 %v105_v24, %v104_v23  ;;  %v88_v27 = vld [vmem:[#allocation5 + $0x20] sm:$0xff]  ;;  %v89_v28 = vld [vmem:[#allocation5 + $0x28] sm:$0xff] }
  0x3f   :  { %v197_v25 = vpack.c.bf16 %v119_v22, %v118_v20  ;;  %v136_v29 = vld [vmem:[#allocation5 + $0x1a0] sm:$0xff]  ;;  %v137_v30 = vld [vmem:[#allocation5 + $0x1a8] sm:$0xff]  ;;  %v182_v33 = vpack.c.bf16 %v89_v28, %v88_v27  ;;  %v106_v35 = vld [vmem:[#allocation5 + $0xb0] sm:$0xff] }
  0x40   :  { %495 = vmatprep.subr.bf16.mxu1 %v205_v21  ;;  %v120_v31 = vld [vmem:[#allocation5 + $0x120] sm:$0xff]  ;;  %v121_v32 = vld [vmem:[#allocation5 + $0x128] sm:$0xff]  ;;  %474 = vmatpush3.bf16.msra.mxu0 %v181_v17  ;;  %v206_v34 = vpack.c.bf16 %v137_v30, %v136_v29  ;;  %v107_v36 = vld [vmem:[#allocation5 + $0xb8] sm:$0xff] }
  0x41   :  { %v90_v37 = vld [vmem:[#allocation5 + $0x30] sm:$0xff]  ;;  %475 = vmatprep.subr.bf16.mxu0 %v190_v26  ;;  %v198_v38 = vpack.c.bf16 %v121_v32, %v120_v31  ;;  %v191_v39 = vpack.c.bf16 %v107_v36, %v106_v35  ;;  %v91_v40 = vld [vmem:[#allocation5 + $0x38] sm:$0xff]  ;;  %v108_v46 = vld [vmem:[#allocation5 + $0xc0] sm:$0xff] }
  0x42   :  { %496 = vmatpush3.bf16.msra.mxu1 %v197_v25  ;;  %v138_v41 = vld [vmem:[#allocation5 + $0x1b0] sm:$0xff]  ;;  %v139_v42 = vld [vmem:[#allocation5 + $0x1b8] sm:$0xff]  ;;  %v109_v47 = vld [vmem:[#allocation5 + $0xc8] sm:$0xff]  ;;  %v183_v48 = vpack.c.bf16 %v91_v40, %v90_v37 }
  0x43   :  { %497 = vmatprep.subr.bf16.mxu1 %v206_v34  ;;  %v207_v43 = vpack.c.bf16 %v139_v42, %v138_v41  ;;  %v122_v44 = vld [vmem:[#allocation5 + $0x130] sm:$0xff]  ;;  %v123_v45 = vld [vmem:[#allocation5 + $0x138] sm:$0xff]  ;;  %v140_v49 = vld [vmem:[#allocation5 + $0x1c0] sm:$0xff]  ;;  %v192_v52 = vpack.c.bf16 %v109_v47, %v108_v46 }
  0x44   :  { %476 = vmatpush3.bf16.msra.mxu0 %v182_v33  ;;  %v141_v50 = vld [vmem:[#allocation5 + $0x1c8] sm:$0xff]  ;;  %v199_v51 = vpack.c.bf16 %v123_v45, %v122_v44  ;;  %v92_v53 = vld [vmem:[#allocation5 + $0x40] sm:$0xff]  ;;  %v110_v58 = vld [vmem:[#allocation5 + $0xd0] sm:$0xff] }
  0x45   :  { %477 = vmatprep.subr.bf16.mxu0 %v191_v39  ;;  %v93_v54 = vld [vmem:[#allocation5 + $0x48] sm:$0xff]  ;;  %v124_v55 = vld [vmem:[#allocation5 + $0x140] sm:$0xff]  ;;  %v208_v56 = vpack.c.bf16 %v141_v50, %v140_v49  ;;  %v111_v59 = vld [vmem:[#allocation5 + $0xd8] sm:$0xff] }
  0x46   :  { %498 = vmatpush3.bf16.msra.mxu1 %v198_v38  ;;  %v125_v57 = vld [vmem:[#allocation5 + $0x148] sm:$0xff]  ;;  %v142_v60 = vld [vmem:[#allocation5 + $0x1d0] sm:$0xff]  ;;  %v143_v61 = vld [vmem:[#allocation5 + $0x1d8] sm:$0xff]  ;;  %v184_v62 = vpack.c.bf16 %v93_v54, %v92_v53  ;;  %v193_v0 = vpack.c.bf16 %v111_v59, %v110_v58 }
  0x47   :  { %499 = vmatprep.subr.bf16.mxu1 %v207_v43  ;;  %v200_v63 = vpack.c.bf16 %v125_v57, %v124_v55  ;;  %v94_v1 = vld [vmem:[#allocation5 + $0x50] sm:$0xff]  ;;  %v95_v2 = vld [vmem:[#allocation5 + $0x58] sm:$0xff]  ;;  %v209_v4 = vpack.c.bf16 %v143_v61, %v142_v60  ;;  %v112_v6 = vld [vmem:[#allocation5 + $0xe0] sm:$0xff] }
  0x48   :  { %478 = vmatpush3.bf16.msra.mxu0 %v183_v48  ;;  %v126_v3 = vld [vmem:[#allocation5 + $0x150] sm:$0xff]  ;;  %v127_v5 = vld [vmem:[#allocation5 + $0x158] sm:$0xff]  ;;  %v113_v7 = vld [vmem:[#allocation5 + $0xe8] sm:$0xff]  ;;  %v185_v10 = vpack.c.bf16 %v95_v2, %v94_v1 }
  0x49   :  { %479 = vmatprep.subr.bf16.mxu0 %v192_v52  ;;  %v144_v8 = vld [vmem:[#allocation5 + $0x1e0] sm:$0xff]  ;;  %v145_v9 = vld [vmem:[#allocation5 + $0x1e8] sm:$0xff]  ;;  %v201_v14 = vpack.c.bf16 %v127_v5, %v126_v3  ;;  %v194_v15 = vpack.c.bf16 %v113_v7, %v112_v6  ;;  %v73_v18 = vld [vmem:[#allocation2 + $0x38] sm:$0xff] }
  0x4a   :  { %500 = vmatpush3.bf16.msra.mxu1 %v199_v51  ;;  %v96_v11 = vld [vmem:[#allocation5 + $0x60] sm:$0xff]  ;;  %v97_v12 = vld [vmem:[#allocation5 + $0x68] sm:$0xff]  ;;  %v210_v19 = vpack.c.bf16 %v145_v9, %v144_v8  ;;  %v114_v20 = vld [vmem:[#allocation5 + $0xf0] sm:$0xff] }
  0x4b   :  { %501 = vmatprep.subr.bf16.mxu1 %v208_v56  ;;  %v67_v13 = vld [vmem:[#allocation2 + $0x8] sm:$0xff]  ;;  %v128_v16 = vld [vmem:[#allocation5 + $0x160] sm:$0xff]  ;;  %v115_v21 = vld [vmem:[#allocation5 + $0xf8] sm:$0xff]  ;;  %v186_v27 = vpack.c.bf16 %v97_v12, %v96_v11 }
  0x4c   :  { %480 = vmatpush3.bf16.msra.mxu0 %v184_v62  ;;  %v129_v17 = vld [vmem:[#allocation5 + $0x168] sm:$0xff]  ;;  %v146_v22 = vld [vmem:[#allocation5 + $0x1f0] sm:$0xff]  ;;  %v79_v23 = vpack.c.bf16 %v73_v18, %v67_v13  ;;  %v147_v24 = vld [vmem:[#allocation5 + $0x1f8] sm:$0xff]  ;;  %v195_v30 = vpack.c.bf16 %v115_v21, %v114_v20 }
  0x4d   :  { %481 = vmatprep.subr.bf16.mxu0 %v193_v0  ;;  %v69_v25 = vld [vmem:[#allocation2 + $0x18] sm:$0xff]  ;;  %v75_v26 = vld [vmem:[#allocation2 + $0x48] sm:$0xff]  ;;  %v202_v29 = vpack.c.bf16 %v129_v17, %v128_v16  ;;  %v98_v31 = vld [vmem:[#allocation5 + $0x70] sm:$0xff]  ;;  %v211_v34 = vpack.c.bf16 %v147_v24, %v146_v22 }
  0x4e   :  { %502 = vmatpush3.bf16.msra.mxu1 %v200_v63  ;;  %267 = vmatprep.mubr.bf16.mxu0 %v79_v23  ;;  %v81_v28 = vpack.c.bf16 %v75_v26, %v69_v25  ;;  %v99_v32 = vld [vmem:[#allocation5 + $0x78] sm:$0xff]  ;;  %v130_v33 = vld [vmem:[#allocation5 + $0x170] sm:$0xff]  ;;  %v164_v36 = vld [vmem:[#allocation5 + $0x280] sm:$0xff] }
  0x4f   :  { %503 = vmatprep.subr.bf16.mxu1 %v209_v4  ;;  %v131_v35 = vld [vmem:[#allocation5 + $0x178] sm:$0xff]  ;;  %v165_v37 = vld [vmem:[#allocation5 + $0x288] sm:$0xff]  ;;  %v187_v38 = vpack.c.bf16 %v99_v32, %v98_v31  ;;  %v66_v39 = vld [vmem:[#allocation2] sm:$0xff] }
  0x50   :  { %482 = vmatpush3.bf16.msra.mxu0 %v185_v10  ;;  %308 = vmatprep.mubr.bf16.mxu1 %v81_v28  ;;  %v72_v40 = vld [vmem:[#allocation2 + $0x30] sm:$0xff]  ;;  %v148_v41 = vld [vmem:[#allocation5 + $0x200] sm:$0xff]  ;;  %v203_v42 = vpack.c.bf16 %v131_v35, %v130_v33  ;;  %v220_v43 = vpack.c.bf16 %v165_v37, %v164_v36  ;;  %v149_v44 = vld [vmem:[#allocation5 + $0x208] sm:$0xff]  ;;  %v702_v37 = vmov 0.0  }
  0x51   :  { %483 = vmatprep.subr.bf16.mxu0 %v194_v15  ;;  %v68_v45 = vld [vmem:[#allocation2 + $0x10] sm:$0xff]  ;;  %v74_v46 = vld [vmem:[#allocation2 + $0x40] sm:$0xff]  ;;  %v167_v48 = vld [vmem:[#allocation5 + $0x298] sm:$0xff]  ;;  %v78_v49 = vpack.c.bf16 %v72_v40, %v66_v39  ;;  %v212_v50 = vpack.c.bf16 %v149_v44, %v148_v41 }
  0x52   :  { %504 = vmatpush3.bf16.msra.mxu1 %v201_v14  ;;  %v166_v47 = vld [vmem:[#allocation5 + $0x290] sm:$0xff]  ;;  %v80_v51 = vpack.c.bf16 %v74_v46, %v68_v45  ;;  %v151_v54 = vld [vmem:[#allocation5 + $0x218] sm:$0xff]  ;;  %v168_v55 = vld [vmem:[#allocation5 + $0x2a0] sm:$0xff] }
  0x53   :  { %505 = vmatprep.subr.bf16.mxu1 %v210_v19  ;;  %v221_v52 = vpack.c.bf16 %v167_v48, %v166_v47  ;;  %v150_v53 = vld [vmem:[#allocation5 + $0x210] sm:$0xff]  ;;  %v169_v56 = vld [vmem:[#allocation5 + $0x2a8] sm:$0xff]  ;;  %v77_v58 = vld [vmem:[#allocation2 + $0x58] sm:$0xff] }
  0x54   :  { %484 = vmatpush3.bf16.msra.mxu0 %v186_v27  ;;  %v71_v57 = vld [vmem:[#allocation2 + $0x28] sm:$0xff]  ;;  %v213_v59 = vpack.c.bf16 %v151_v54, %v150_v53  ;;  %v222_v61 = vpack.c.bf16 %v169_v56, %v168_v55  ;;  %v152_v62 = vld [vmem:[#allocation5 + $0x220] sm:$0xff]  ;;  %v170_v0 = vld [vmem:[#allocation5 + $0x2b0] sm:$0xff] }
  0x55   :  { %485 = vmatprep.subr.bf16.mxu0 %v195_v30  ;;  %v83_v60 = vpack.c.bf16 %v77_v58, %v71_v57  ;;  %v153_v63 = vld [vmem:[#allocation5 + $0x228] sm:$0xff]  ;;  %v171_v1 = vld [vmem:[#allocation5 + $0x2b8] sm:$0xff]  ;;  %v154_v4 = vld [vmem:[#allocation5 + $0x230] sm:$0xff] }
  0x56   :  { %506 = vmatpush3.bf16.msra.mxu1 %v202_v29  ;;  %v214_v2 = vpack.c.bf16 %v153_v63, %v152_v62  ;;  %v223_v3 = vpack.c.bf16 %v171_v1, %v170_v0  ;;  %v155_v5 = vld [vmem:[#allocation5 + $0x238] sm:$0xff]  ;;  %v172_v6 = vld [vmem:[#allocation5 + $0x2c0] sm:$0xff]  ;;  %v173_v7 = vld [vmem:[#allocation5 + $0x2c8] sm:$0xff] }
  0x57   :  { %507 = vmatprep.subr.bf16.mxu1 %v211_v34  ;;  %v215_v8 = vpack.c.bf16 %v155_v5, %v154_v4  ;;  %v224_v9 = vpack.c.bf16 %v173_v7, %v172_v6  ;;  %v156_v10 = vld [vmem:[#allocation5 + $0x240] sm:$0xff]  ;;  %v157_v11 = vld [vmem:[#allocation5 + $0x248] sm:$0xff]  ;;  %v174_v12 = vld [vmem:[#allocation5 + $0x2d0] sm:$0xff] }
  0x58   :  { %486 = vmatpush3.bf16.msra.mxu0 %v187_v38  ;;  %v175_v13 = vld [vmem:[#allocation5 + $0x2d8] sm:$0xff]  ;;  %v216_v14 = vpack.c.bf16 %v157_v11, %v156_v10  ;;  %v158_v16 = vld [vmem:[#allocation5 + $0x250] sm:$0xff]  ;;  %v176_v18 = vld [vmem:[#allocation5 + $0x2e0] sm:$0xff] }
  0x59   :  { %515 = vmatprep.subr.bf16.mxu0 %v220_v43  ;;  %v225_v15 = vpack.c.bf16 %v175_v13, %v174_v12  ;;  %v159_v17 = vld [vmem:[#allocation5 + $0x258] sm:$0xff]  ;;  %v177_v19 = vld [vmem:[#allocation5 + $0x2e8] sm:$0xff]  ;;  %v160_v22 = vld [vmem:[#allocation5 + $0x260] sm:$0xff] }
  0x5a   :  { %508 = vmatpush3.bf16.msra.mxu1 %v203_v42  ;;  %v217_v20 = vpack.c.bf16 %v159_v17, %v158_v16  ;;  %v226_v21 = vpack.c.bf16 %v177_v19, %v176_v18  ;;  %v161_v23 = vld [vmem:[#allocation5 + $0x268] sm:$0xff]  ;;  %v178_v24 = vld [vmem:[#allocation5 + $0x2f0] sm:$0xff]  ;;  %v179_v25 = vld [vmem:[#allocation5 + $0x2f8] sm:$0xff] }
  0x5b   :  { %268 = vmatmul.mubr.bf16.vlgmr.msra.gmra.mrb[0].mxu0 %v78_v49  ;;  %v218_v26 = vpack.c.bf16 %v161_v23, %v160_v22  ;;  %v227_v27 = vpack.c.bf16 %v179_v25, %v178_v24  ;;  %v162_v28 = vld [vmem:[#allocation5 + $0x270] sm:$0xff]  ;;  %v163_v29 = vld [vmem:[#allocation5 + $0x278] sm:$0xff]  ;;  %v70_v31 = vld [vmem:[#allocation2 + $0x20] sm:$0xff]  ;;  %546 = vmatprep.subr.bf16.mxu1 %v702_v37 }
  0x5c   :  { %516 = vmatpush3.bf16.msra.mxu0 %v212_v50  ;;  %349 = vmatprep.mubr.bf16.mxu0 %v83_v60  ;;  %v219_v30 = vpack.c.bf16 %v163_v29, %v162_v28  ;;  %v76_v32 = vld [vmem:[#allocation2 + $0x50] sm:$0xff]  ;;  %v361_v34 = vld [vmem:[#allocation7] sm:$0xff]  ;;  %v362_v35 = vld [vmem:[#allocation7 + $0x8] sm:$0xff] }
  0x5d   :  { %309 = vmatmul.mubr.bf16.vlgmr.msra.gmra.mrb[0].mxu1 %v80_v51  ;;  %517 = vmatprep.subr.bf16.mxu0 %v221_v52  ;;  %v82_v33 = vpack.c.bf16 %v76_v32, %v70_v31  ;;  %v363_v36 = vld [vmem:[#allocation7 + $0x10] sm:$0xff]  ;;  %v377_v38 = vpack.c.bf16 %v362_v35, %v361_v34  ;;  %v364_v39 = vld [vmem:[#allocation7 + $0x18] sm:$0xff]  ;;  %v365_v41 = vld [vmem:[#allocation7 + $0x20] sm:$0xff] }
  0x5e   :  { %v378_v40 = vpack.c.bf16 %v364_v39, %v363_v36  ;;  %v366_v42 = vld [vmem:[#allocation7 + $0x28] sm:$0xff]  ;;  %v367_v44 = vld [vmem:[#allocation7 + $0x30] sm:$0xff]  ;;  %v368_v45 = vld [vmem:[#allocation7 + $0x38] sm:$0xff]  ;;  %562 = vmatprep.mubr.msk.bf16.mxu1 %vm703_vm0, %v702_v37 }
  0x5f   :  { %547 = vmatpush3.bf16.msra.mxu1 %v377_v38  ;;  %v379_v43 = vpack.c.bf16 %v366_v42, %v365_v41  ;;  %v380_v46 = vpack.c.bf16 %v368_v45, %v367_v44  ;;  %v369_v47 = vld [vmem:[#allocation7 + $0x40] sm:$0xff]  ;;  %v370_v48 = vld [vmem:[#allocation7 + $0x48] sm:$0xff]  ;;  %v371_v50 = vld [vmem:[#allocation7 + $0x50] sm:$0xff] }
  0x60   :  { %518 = vmatpush3.bf16.msra.mxu0 %v213_v59  ;;  %548 = vmatprep.subr.bf16.mxu1 %v702_v37  ;;  %v381_v49 = vpack.c.bf16 %v370_v48, %v369_v47  ;;  %v372_v51 = vld [vmem:[#allocation7 + $0x58] sm:$0xff]  ;;  %v373_v53 = vld [vmem:[#allocation7 + $0x60] sm:$0xff]  ;;  %v374_v54 = vld [vmem:[#allocation7 + $0x68] sm:$0xff] }
  0x61   :  { %519 = vmatprep.subr.bf16.mxu0 %v222_v61  ;;  %v382_v52 = vpack.c.bf16 %v372_v51, %v371_v50  ;;  %v383_v55 = vpack.c.bf16 %v374_v54, %v373_v53  ;;  %v375_v56 = vld [vmem:[#allocation7 + $0x70] sm:$0xff]  ;;  %v376_v57 = vld [vmem:[#allocation7 + $0x78] sm:$0xff]  ;;  %v469_v60 = vld [vmem:[%s821_s2] ss:$0 sm:$0xff]  ;;  %s704_s2 = smov [#allocation8]  }
  0x62   :  { %v384_v58 = vpack.c.bf16 %v376_v57, %v375_v56  ;;  %s440_s14 = sshll.u32 %s704_s2, 4  ;;  %s441_s14 = int_to_ptr.vmem [resolvable:$true] %s440_s14 }
  0x63   :  { %549 = vmatpush3.bf16.msra.mxu1 %v378_v40  ;;  %s643_s15 = scalar_lea.vmem %s441_s14, 256  ;;  %p648_p11 = scmp.lt.s32.totalorder %s441_s14, %s441_s14 }
  0x64   :  { %520 = vmatpush3.bf16.msra.mxu0 %v214_v2  ;;  %550 = vmatprep.subr.bf16.mxu1 %v702_v37  ;;  %p644_p10 = scmp.ne.s32.totalorder %s441_s14, %s643_s15  ;;  %p649_p12 = scmp.lt.s32.totalorder %s643_s15, %s643_s15 }
  0x65   :  { %521 = vmatprep.subr.bf16.mxu0 %v223_v3 }
  0x66   :  { %p650_p13 = por %p649_p12, %p648_p11 }
  0x67   :  { %551 = vmatpush3.bf16.msra.mxu1 %v379_v43 }
  0x68   :  { %522 = vmatpush3.bf16.msra.mxu0 %v215_v8  ;;  %552 = vmatprep.subr.bf16.mxu1 %v702_v37  ;;  %p651_p0 = pnand %p650_p13, %p644_p10 }
  0x69   :  { %523 = vmatprep.subr.bf16.mxu0 %v224_v9 }
  0x6b   :  { %553 = vmatpush3.bf16.msra.mxu1 %v380_v46 }
  0x6c   :  { %524 = vmatpush3.bf16.msra.mxu0 %v216_v14  ;;  %554 = vmatprep.subr.bf16.mxu1 %v702_v37 }
  0x6d   :  { %525 = vmatprep.subr.bf16.mxu0 %v225_v15 }
  0x6f   :  { %555 = vmatpush3.bf16.msra.mxu1 %v381_v49 }
  0x70   :  { %526 = vmatpush3.bf16.msra.mxu0 %v217_v20  ;;  %556 = vmatprep.subr.bf16.mxu1 %v702_v37 }
  0x71   :  { %527 = vmatprep.subr.bf16.mxu0 %v226_v21 }
  0x73   :  { %557 = vmatpush3.bf16.msra.mxu1 %v382_v52 }
  0x74   :  { %528 = vmatpush3.bf16.msra.mxu0 %v218_v26  ;;  %558 = vmatprep.subr.bf16.mxu1 %v702_v37 }
  0x75   :  { %529 = vmatprep.subr.bf16.mxu0 %v227_v27 }
  0x77   :  { %559 = vmatpush3.bf16.msra.mxu1 %v383_v55 }
  0x78   :  { %530 = vmatpush3.bf16.msra.mxu0 %v219_v30  ;;  %560 = vmatprep.subr.bf16.mxu1 %v702_v37 }
  0x7b   :  { %350 = vmatmul.mubr.bf16.vlgmr.msra.gmra.mrb[4].mxu0 %v82_v33  ;;  %561 = vmatpush3.bf16.msra.mxu1 %v384_v58 }
 0x12e   :  { %v487_v59 = vpop.f32.mrb[0].mxu0 }
 0x12f   :  { %v488_v61 = vpop.f32.mrb[1].mxu0 }
 0x130   :  { %v509_v62 = vpop.f32.mrb[0].mxu1  ;;  %v489_v63 = vadd.f32 %v488_v61, %v487_v59  ;;  %v490_v0 = vpop.f32.mrb[2].mxu0 }
 0x131   :  { %v510_v1 = vpop.f32.mrb[1].mxu1  ;;  %v491_v2 = vpop.f32.mrb[3].mxu0 }
 0x132   :  { %v511_v3 = vadd.f32 %v510_v1, %v509_v62  ;;  %v512_v4 = vpop.f32.mrb[2].mxu1  ;;  %v270_v5 = vadd.f32 %v489_v63, %v469_v60  ;;  %v492_v6 = vadd.f32 %v491_v2, %v490_v0 }
 0x133   :  { %v513_v7 = vpop.f32.mrb[3].mxu1 }
 0x134   :  { %v514_v8 = vadd.f32 %v513_v7, %v512_v4  ;;  %v273_v9 = vadd.f32 %v492_v6, %v469_v60  ;;  %v311_v10 = vadd.f32 %v511_v3, %v270_v5 }
 0x136   :  { %v314_v11 = vadd.f32 %v514_v8, %v273_v9 }
 0x14e   :  { %v531_v12 = vpop.f32.mrb[4].mxu0 }
 0x14f   :  { %v532_v13 = vpop.f32.mrb[5].mxu0 }
 0x150   :  { %v533_v14 = vadd.f32 %v532_v13, %v531_v12  ;;  %v534_v15 = vpop.f32.mrb[6].mxu0 }
 0x151   :  { %v535_v16 = vpop.f32.mrb[7].mxu0 }
 0x152   :  { %v352_v17 = vadd.f32 %v533_v14, %v311_v10  ;;  %v536_v18 = vadd.f32 %v535_v16, %v534_v15 }
 0x154   :  { %358 = vst [vmem:[#allocation8] sm:$0xff] %v352_v17  ;;  %v355_v19 = vadd.f32 %v536_v18, %v314_v11 }
 0x156   :  { %v360_v20 = vpack.c.bf16 %v355_v19, %v352_v17  ;;  %359 = vst [vmem:[#allocation8 + $0x8] sm:$0xff] %v355_v19 }
 0x158   :  { %563 = vmatmul.mubr.bf16.vlgmr.msra.gmra.mrb[4].mxu1 %v360_v20 }
 0x159   :  { %654 = shalt.err (!%p651_p0)
}
 0x15a   :  { %s655_s18 = scalar_lea.hbm %s824_s5, 256 }
 0x15b   :  { %p656_p1 = scmp.ne.s32.totalorder %s824_s5, %s655_s18  ;;  %p659_p2 = scmp.lt.u32.totalorder %s655_s18, %s824_s5 }
 0x15d   :  { %p661_p3 = pnand %p659_p2, %p656_p1 }
 0x15f   :  { %664 = shalt.err (!%p661_p3)
}
 0x160   :  { %446 = dma.vmem_to_hbm [thread:$0]  %s441_s14, 256, %s824_s5, [#allocation4], %s696_s7, %s696_s7, %s697_s8  }
 0x161   :  { %v470_v21 = vld [vmem:[%s823_s4] ss:$0 sm:$0xff]  ;;  %s705_s26 = smov [#allocation9]  }
 0x162   :  { %s452_s27 = sshll.u32 %s705_s26, 4  ;;  %s453_s27 = int_to_ptr.vmem [resolvable:$true] %s452_s27 }
 0x163   :  { %s665_s28 = scalar_lea.vmem %s453_s27, 256  ;;  %p670_p5 = scmp.lt.s32.totalorder %s453_s27, %s453_s27 }
 0x164   :  { %p666_p4 = scmp.ne.s32.totalorder %s453_s27, %s665_s28  ;;  %p671_p6 = scmp.lt.s32.totalorder %s665_s28, %s665_s28 }
 0x166   :  { %p672_p7 = por %p671_p6, %p670_p5 }
 0x168   :  { %p673_p8 = pnand %p672_p7, %p666_p4 }
 0x22b   :  { %v426_v22 = vpop.f32.mrb[4].mxu1 }
 0x22c   :  { %v427_v23 = vadd.f32 %v470_v21, %v426_v22  ;;  %v564_v24 = vpop.f32.mrb[5].mxu1 }
 0x22d   :  { %v429_v25 = vpop.f32.mrb[6].mxu1 }
 0x22e   :  { %433 = vst [vmem:[#allocation9] sm:$0xff] %v427_v23  ;;  %v430_v26 = vadd.f32 %v470_v21, %v429_v25  ;;  %v565_v27 = vpop.f32.mrb[7].mxu1 }
 0x230   :  { %434 = vst [vmem:[#allocation9 + $0x8] sm:$0xff] %v430_v26 }
 0x231   :  { %676 = shalt.err (!%p673_p8)
}
 0x232   :  { %s677_s29 = scalar_lea.hbm %s825_s6, 256 }
 0x233   :  { %p678_p9 = scmp.ne.s32.totalorder %s825_s6, %s677_s29  ;;  %p681_p10 = scmp.lt.u32.totalorder %s677_s29, %s825_s6 }
 0x235   :  { %p683_p11 = pnand %p681_p10, %p678_p9 }
 0x237   :  { %686 = shalt.err (!%p683_p11)
}
 0x238   :  { %458 = dma.vmem_to_hbm [thread:$0]  %s453_s27, 256, %s825_s6, [#allocation10], %s696_s7, %s696_s7, %s697_s8  }
 0x239   :  { %691 = dma.done.wait [#allocation4], 256  }
 0x23a   :  { %692 = vsyncadd [#allocation4], 4294967040 }
 0x23b   :  { %693 = dma.done.wait [#allocation10], 256  }
 0x23c   :  { %694 = vsyncadd [#allocation10], 4294967040 }
 0x23d   :  { %465 = vsyncpa [#allocation3], 1 }
 0x23e   :  { %466 = vsyncpa [#allocation6], 1 }
 0x23f   :  { %467 = vsyncpa [#allocation4], 1 }
 0x240   :  { %468 = vsyncpa [#allocation10], 1 }

</bundles_post_ra>
